<compile_context>
chip_gen: v7x
topology: tpu7x:2x2x1
jax: 0.10.0
libtpu: 0.0.40
codegen_flags: <defaults>
</compile_context>

<pallas_src>
import functools

import jax
import jax.numpy as jnp
from jax import lax
from jax.experimental import pallas as pl
from jax.experimental.pallas import tpu as pltpu


def mha_fused_kernel(x_ref, wqkv_ref, wo_ref, bo_ref, o_ref, *,
                     bblk, seq_len, n_heads, head_size):
    """One batch-block: fused QKV proj + per-head causal attention + out proj."""
    T, H, hs = seq_len, n_heads, head_size
    D = H * hs
    M = bblk * T

    x = x_ref[...]                                                       # (M, E) rows

    # One wide, batch-folded QKV projection for every row and every head: (M, 3*D).
    qkv = jnp.dot(x, wqkv_ref[...], preferred_element_type=jnp.float32)

    # View as (bblk, T, 3*D): leading-dim split along full 8-row tiles (layout no-op).
    qkv3 = qkv.reshape(bblk, T, 3 * D)

    # Causal mask, built once, shared by every batch element and head.
    row = lax.broadcasted_iota(jnp.int32, (T, T), 0)
    col = lax.broadcasted_iota(jnp.int32, (T, T), 1)
    causal = col <= row
    neg_big = jnp.float32(-1e30)                                          # finite -> NaN-safe
    scale = jnp.float32(head_size ** -0.5)

    head_outs = []
    for h in range(H):                                                    # static unroll (H small)
        q = qkv3[:, :, h * hs:(h + 1) * hs] * scale                       # (bblk, T, hs)
        k = qkv3[:, :, D + h * hs:D + (h + 1) * hs]
        v = qkv3[:, :, 2 * D + h * hs:2 * D + (h + 1) * hs]

        # q @ k^T batched over the batch elements of the block (no k.T materialized).
        s = jnp.einsum('bqd,bkd->bqk', q, k,
                       preferred_element_type=jnp.float32)                # (bblk, T, T)
        s = jnp.where(causal, s, neg_big)

        s = s - jnp.max(s, axis=-1, keepdims=True)
        p = jnp.exp(s)
        p = p / jnp.sum(p, axis=-1, keepdims=True)                        # exact softmax, f32

        head_outs.append(
            jnp.einsum('bqk,bkd->bqd', p, v,
                       preferred_element_type=jnp.float32))               # (bblk, T, hs)

    heads = jnp.concatenate(head_outs, axis=-1)                           # (bblk, T, D)
    heads2 = heads.reshape(M, D)                                          # merge leading dims (no-op)

    # Fused output projection + bias; single contiguous (M, E) store.
    y = jnp.dot(heads2, wo_ref[...], preferred_element_type=jnp.float32)
    y = y + bo_ref[...]                                                   # (1, E) broadcasts
    o_ref[...] = y.astype(o_ref.dtype)


def pack_qkv_weights(wq, wk, wv):
    """One-time packing (parameter-init time, hoisted out of the forward path).

    wq/wk/wv: (H, E, hs)  ->  (E, 3*H*hs) with columns [Q h0..hH-1 | K ... | V ...].
    """
    H, E, hs = wq.shape
    D = H * hs
    packed = [w.transpose(1, 0, 2).reshape(E, D) for w in (wq, wk, wv)]
    return jnp.concatenate(packed, axis=1)


def multi_head_attention(x, w_qkv, wo, bo, *, n_heads, head_size, grid_blocks=None):
    """x: (B,T,E); w_qkv: (E, 3*H*hs) packed; wo: (H*hs, E); bo: (E,)."""
    B, T, E = x.shape
    H, hs = n_heads, head_size
    D = H * hs

    # Keep 2 grid steps (when B splits evenly) so both TensorCores get work on
    # v7x; on single-TC v5e/v6e pass grid_blocks=1 to fully collapse the grid.
    if grid_blocks is None:
        grid_blocks = 2 if (B >= 2 and B % 2 == 0) else 1
    assert B % grid_blocks == 0, (B, grid_blocks)
    bblk = B // grid_blocks

    x2 = x.reshape(B * T, E)                                              # fold batch into M rows

    out2 = pl.pallas_call(
        functools.partial(mha_fused_kernel, bblk=bblk, seq_len=T,
                          n_heads=H, head_size=hs),
        out_shape=jax.ShapeDtypeStruct((B * T, E), x.dtype),
        grid=(grid_blocks,),
        in_specs=[
            pl.BlockSpec((bblk * T, E), lambda g: (g, 0)),                # rows of this batch block
            pl.BlockSpec((E, 3 * D), lambda g: (0, 0)),                   # fused QKV weight (resident)
            pl.BlockSpec((D, E), lambda g: (0, 0)),                       # out-proj weight (resident)
            pl.BlockSpec((1, E), lambda g: (0, 0)),                       # out-proj bias  (resident)
        ],
        out_specs=pl.BlockSpec((bblk * T, E), lambda g: (g, 0)),
        compiler_params=pltpu.CompilerParams(
            dimension_semantics=("parallel",),                            # shard blocks across cores
            vmem_limit_bytes=32 * 1024 * 1024),
    )(x2, w_qkv, wo, bo.reshape(1, E))

    return out2.reshape(B, T, E)


def reference(x, wq, wk, wv, wo, bo):
    """Pure-JAX reference matching the PyTorch module (dropout=None), f32-exact."""
    B, T, E = x.shape
    H, _, hs = wq.shape
    hp = jax.lax.Precision.HIGHEST
    q = jnp.einsum('bte,hes->bhts', x, wq, precision=hp)
    k = jnp.einsum('bte,hes->bhts', x, wk, precision=hp)
    v = jnp.einsum('bte,hes->bhts', x, wv, precision=hp)
    s = jnp.einsum('bhts,bhus->bhtu', q, k, precision=hp) * (hs ** -0.5)
    mask = jnp.tril(jnp.ones((T, T), bool))
    s = jnp.where(mask, s, -jnp.inf)
    p = jax.nn.softmax(s, axis=-1)
    o = jnp.einsum('bhtu,bhus->bhts', p, v, precision=hp)
    cat = o.transpose(0, 2, 1, 3).reshape(B, T, H * hs)
    return jnp.einsum('btd,de->bte', cat, wo, precision=hp) + bo


if __name__ == "__main__":
    # Shapes consistent with the module: context_size=T=8, embed=32, head_size=8,
    # n_heads=4, dropout=None, decoder=True.  B=4 so the batch fold (bblk=2 rows
    # per grid step) is actually exercised while keeping 2 grid steps.
    B, T, E, hs, H = 4, 8, 32, 8, 4

    key = jax.random.PRNGKey(0)
    kx, kq, kk, kv, kw, kb = jax.random.split(key, 6)

    x = jax.random.normal(kx, (B, T, E), jnp.float32)
    wq = jax.random.normal(kq, (H, E, hs), jnp.float32) * 0.1
    wk = jax.random.normal(kk, (H, E, hs), jnp.float32) * 0.1
    wv = jax.random.normal(kv, (H, E, hs), jnp.float32) * 0.1
    wo = jax.random.normal(kw, (H * hs, E), jnp.float32) * 0.1
    bo = jax.random.normal(kb, (E,), jnp.float32) * 0.1

    # One-time parameter packing (parameter-init time, not per-forward).
    w_qkv = pack_qkv_weights(wq, wk, wv)

    out = jax.block_until_ready(
        multi_head_attention(x, w_qkv, wo, bo, n_heads=H, head_size=hs))
    ref = jax.block_until_ready(reference(x, wq, wk, wv, wo, bo))

    assert out.shape == (B, T, E), out.shape
    err = float(jnp.max(jnp.abs(out - ref)))
    # Tightened vs the previous version: no bf16 casts, no approximate reciprocal.
    assert jnp.allclose(out, ref, atol=5e-3, rtol=5e-3), err

    print("KERNEL_OK")
</pallas_src>

<mosaic_0001>
module attributes {stable_mosaic.version = 11 : i64} {
  func.func @mha_fused_kernel(%arg0: i32, %arg1: memref<16x32xf32, #tpu.memory_space<vmem>>, %arg2: memref<32x96xf32, #tpu.memory_space<vmem>>, %arg3: memref<32x32xf32, #tpu.memory_space<vmem>>, %arg4: memref<1x32xf32, #tpu.memory_space<vmem>>, %arg5: memref<16x32xf32, #tpu.memory_space<vmem>>) attributes {dimension_semantics = [#tpu.dimension_semantics<parallel>], iteration_bounds = array<i64: 2>, scalar_prefetch = 0 : i64, scratch_operands = 0 : i64, tpu.core_type = #tpu.core_type<tc>, window_params = [{transform_indices = @transform_0, window_bounds = array<i64: 16, 32>}, {pipeline_mode = #tpu.pipeline_mode<synchronous>, transform_indices = @transform_1, window_bounds = array<i64: 32, 96>}, {pipeline_mode = #tpu.pipeline_mode<synchronous>, transform_indices = @transform_2, window_bounds = array<i64: 32, 32>}, {pipeline_mode = #tpu.pipeline_mode<synchronous>, transform_indices = @transform_3, window_bounds = array<i64: 1, 32>}, {transform_indices = @transform_4, window_bounds = array<i64: 16, 32>}]} {
    %c0 = arith.constant 0 : index
    %c0_0 = arith.constant 0 : index
    %0 = vector.load %arg1[%c0, %c0_0] : memref<16x32xf32, #tpu.memory_space<vmem>>, vector<16x32xf32>
    %c0_1 = arith.constant 0 : index
    %c0_2 = arith.constant 0 : index
    %1 = vector.load %arg2[%c0_1, %c0_2] : memref<32x96xf32, #tpu.memory_space<vmem>>, vector<32x96xf32>
    %cst = arith.constant dense<0.000000e+00> : vector<16x96xf32>
    %2 = tpu.matmul %0, %1, %cst {dimension_numbers = #tpu.dot_dimension_numbers<[1], [0], [0], [1], [0, 0, 1, 1], [], []>} : vector<16x32xf32>, vector<32x96xf32>, vector<16x96xf32> -> vector<16x96xf32>
    %3 = vector.shape_cast %2 : vector<16x96xf32> to vector<2x8x96xf32>
    %4 = tpu.iota {dimensions = array<i32: 0>} : vector<8x8xi32>
    %5 = tpu.iota {dimensions = array<i32: 1>} : vector<8x8xi32>
    %6 = arith.cmpi sle, %5, %4 : vector<8x8xi32>
    %7 = vector.extract_strided_slice %3 {offsets = [0, 0, 0], sizes = [2, 8, 8], strides = [1, 1, 1]} : vector<2x8x96xf32> to vector<2x8x8xf32>
    %cst_3 = arith.constant 0.353553385 : f32
    %8 = vector.broadcast %cst_3 : f32 to vector<2x8x8xf32>
    %9 = arith.mulf %7, %8 : vector<2x8x8xf32>
    %10 = vector.extract_strided_slice %3 {offsets = [0, 0, 32], sizes = [2, 8, 8], strides = [1, 1, 1]} : vector<2x8x96xf32> to vector<2x8x8xf32>
    %11 = vector.extract_strided_slice %3 {offsets = [0, 0, 64], sizes = [2, 8, 8], strides = [1, 1, 1]} : vector<2x8x96xf32> to vector<2x8x8xf32>
    "tpu.trace_start"() <{level = 10 : i32, message = "bqd,bkd->bqk"}> : () -> ()
    %cst_4 = arith.constant dense<0.000000e+00> : vector<2x8x8xf32>
    %12 = tpu.matmul %9, %10, %cst_4 {dimension_numbers = #tpu.dot_dimension_numbers<[2], [2], [1], [1], [0, 0, 0, 1, 1, 1], [0], [0]>} : vector<2x8x8xf32>, vector<2x8x8xf32>, vector<2x8x8xf32> -> vector<2x8x8xf32>
    %cst_5 = arith.constant -1.000000e+30 : f32
    "tpu.trace_stop"() : () -> ()
    %13 = vector.shape_cast %6 : vector<8x8xi1> to vector<1x8x8xi1>
    %14 = vector.broadcast %13 : vector<1x8x8xi1> to vector<2x8x8xi1>
    %15 = vector.broadcast %cst_5 : f32 to vector<2x8x8xf32>
    %16 = arith.select %14, %12, %15 : vector<2x8x8xi1>, vector<2x8x8xf32>
    %cst_6 = arith.constant dense<0xFF800000> : vector<2x8xf32>
    %17 = vector.multi_reduction <maximumf>, %16, %cst_6 [2] : vector<2x8x8xf32> to vector<2x8xf32>
    %18 = vector.shape_cast %17 : vector<2x8xf32> to vector<2x8x1xf32>
    %19 = vector.broadcast %18 : vector<2x8x1xf32> to vector<2x8x8xf32>
    %20 = arith.subf %16, %19 : vector<2x8x8xf32>
    %21 = math.exp %20 : vector<2x8x8xf32>
    %cst_7 = arith.constant dense<0.000000e+00> : vector<2x8xf32>
    %22 = vector.multi_reduction <add>, %21, %cst_7 [2] : vector<2x8x8xf32> to vector<2x8xf32>
    %23 = vector.shape_cast %22 : vector<2x8xf32> to vector<2x8x1xf32>
    %24 = vector.broadcast %23 : vector<2x8x1xf32> to vector<2x8x8xf32>
    %25 = arith.divf %21, %24 : vector<2x8x8xf32>
    "tpu.trace_start"() <{level = 10 : i32, message = "bqk,bkd->bqd"}> : () -> ()
    %cst_8 = arith.constant dense<0.000000e+00> : vector<2x8x8xf32>
    %26 = tpu.matmul %25, %11, %cst_8 {dimension_numbers = #tpu.dot_dimension_numbers<[2], [1], [1], [2], [0, 0, 0, 1, 1, 2], [0], [0]>} : vector<2x8x8xf32>, vector<2x8x8xf32>, vector<2x8x8xf32> -> vector<2x8x8xf32>
    "tpu.trace_stop"() : () -> ()
    %27 = vector.extract_strided_slice %3 {offsets = [0, 0, 8], sizes = [2, 8, 8], strides = [1, 1, 1]} : vector<2x8x96xf32> to vector<2x8x8xf32>
    %cst_9 = arith.constant 0.353553385 : f32
    %28 = vector.broadcast %cst_9 : f32 to vector<2x8x8xf32>
    %29 = arith.mulf %27, %28 : vector<2x8x8xf32>
    %30 = vector.extract_strided_slice %3 {offsets = [0, 0, 40], sizes = [2, 8, 8], strides = [1, 1, 1]} : vector<2x8x96xf32> to vector<2x8x8xf32>
    %31 = vector.extract_strided_slice %3 {offsets = [0, 0, 72], sizes = [2, 8, 8], strides = [1, 1, 1]} : vector<2x8x96xf32> to vector<2x8x8xf32>
    "tpu.trace_start"() <{level = 10 : i32, message = "bqd,bkd->bqk"}> : () -> ()
    %cst_10 = arith.constant dense<0.000000e+00> : vector<2x8x8xf32>
    %32 = tpu.matmul %29, %30, %cst_10 {dimension_numbers = #tpu.dot_dimension_numbers<[2], [2], [1], [1], [0, 0, 0, 1, 1, 1], [0], [0]>} : vector<2x8x8xf32>, vector<2x8x8xf32>, vector<2x8x8xf32> -> vector<2x8x8xf32>
    %cst_11 = arith.constant -1.000000e+30 : f32
    "tpu.trace_stop"() : () -> ()
    %33 = vector.shape_cast %6 : vector<8x8xi1> to vector<1x8x8xi1>
    %34 = vector.broadcast %33 : vector<1x8x8xi1> to vector<2x8x8xi1>
    %35 = vector.broadcast %cst_11 : f32 to vector<2x8x8xf32>
    %36 = arith.select %34, %32, %35 : vector<2x8x8xi1>, vector<2x8x8xf32>
    %cst_12 = arith.constant dense<0xFF800000> : vector<2x8xf32>
    %37 = vector.multi_reduction <maximumf>, %36, %cst_12 [2] : vector<2x8x8xf32> to vector<2x8xf32>
    %38 = vector.shape_cast %37 : vector<2x8xf32> to vector<2x8x1xf32>
    %39 = vector.broadcast %38 : vector<2x8x1xf32> to vector<2x8x8xf32>
    %40 = arith.subf %36, %39 : vector<2x8x8xf32>
    %41 = math.exp %40 : vector<2x8x8xf32>
    %cst_13 = arith.constant dense<0.000000e+00> : vector<2x8xf32>
    %42 = vector.multi_reduction <add>, %41, %cst_13 [2] : vector<2x8x8xf32> to vector<2x8xf32>
    %43 = vector.shape_cast %42 : vector<2x8xf32> to vector<2x8x1xf32>
    %44 = vector.broadcast %43 : vector<2x8x1xf32> to vector<2x8x8xf32>
    %45 = arith.divf %41, %44 : vector<2x8x8xf32>
    "tpu.trace_start"() <{level = 10 : i32, message = "bqk,bkd->bqd"}> : () -> ()
    %cst_14 = arith.constant dense<0.000000e+00> : vector<2x8x8xf32>
    %46 = tpu.matmul %45, %31, %cst_14 {dimension_numbers = #tpu.dot_dimension_numbers<[2], [1], [1], [2], [0, 0, 0, 1, 1, 2], [0], [0]>} : vector<2x8x8xf32>, vector<2x8x8xf32>, vector<2x8x8xf32> -> vector<2x8x8xf32>
    "tpu.trace_stop"() : () -> ()
    %47 = vector.extract_strided_slice %3 {offsets = [0, 0, 16], sizes = [2, 8, 8], strides = [1, 1, 1]} : vector<2x8x96xf32> to vector<2x8x8xf32>
    %cst_15 = arith.constant 0.353553385 : f32
    %48 = vector.broadcast %cst_15 : f32 to vector<2x8x8xf32>
    %49 = arith.mulf %47, %48 : vector<2x8x8xf32>
    %50 = vector.extract_strided_slice %3 {offsets = [0, 0, 48], sizes = [2, 8, 8], strides = [1, 1, 1]} : vector<2x8x96xf32> to vector<2x8x8xf32>
    %51 = vector.extract_strided_slice %3 {offsets = [0, 0, 80], sizes = [2, 8, 8], strides = [1, 1, 1]} : vector<2x8x96xf32> to vector<2x8x8xf32>
    "tpu.trace_start"() <{level = 10 : i32, message = "bqd,bkd->bqk"}> : () -> ()
    %cst_16 = arith.constant dense<0.000000e+00> : vector<2x8x8xf32>
    %52 = tpu.matmul %49, %50, %cst_16 {dimension_numbers = #tpu.dot_dimension_numbers<[2], [2], [1], [1], [0, 0, 0, 1, 1, 1], [0], [0]>} : vector<2x8x8xf32>, vector<2x8x8xf32>, vector<2x8x8xf32> -> vector<2x8x8xf32>
    %cst_17 = arith.constant -1.000000e+30 : f32
    "tpu.trace_stop"() : () -> ()
    %53 = vector.shape_cast %6 : vector<8x8xi1> to vector<1x8x8xi1>
    %54 = vector.broadcast %53 : vector<1x8x8xi1> to vector<2x8x8xi1>
    %55 = vector.broadcast %cst_17 : f32 to vector<2x8x8xf32>
    %56 = arith.select %54, %52, %55 : vector<2x8x8xi1>, vector<2x8x8xf32>
    %cst_18 = arith.constant dense<0xFF800000> : vector<2x8xf32>
    %57 = vector.multi_reduction <maximumf>, %56, %cst_18 [2] : vector<2x8x8xf32> to vector<2x8xf32>
    %58 = vector.shape_cast %57 : vector<2x8xf32> to vector<2x8x1xf32>
    %59 = vector.broadcast %58 : vector<2x8x1xf32> to vector<2x8x8xf32>
    %60 = arith.subf %56, %59 : vector<2x8x8xf32>
    %61 = math.exp %60 : vector<2x8x8xf32>
    %cst_19 = arith.constant dense<0.000000e+00> : vector<2x8xf32>
    %62 = vector.multi_reduction <add>, %61, %cst_19 [2] : vector<2x8x8xf32> to vector<2x8xf32>
    %63 = vector.shape_cast %62 : vector<2x8xf32> to vector<2x8x1xf32>
    %64 = vector.broadcast %63 : vector<2x8x1xf32> to vector<2x8x8xf32>
    %65 = arith.divf %61, %64 : vector<2x8x8xf32>
    "tpu.trace_start"() <{level = 10 : i32, message = "bqk,bkd->bqd"}> : () -> ()
    %cst_20 = arith.constant dense<0.000000e+00> : vector<2x8x8xf32>
    %66 = tpu.matmul %65, %51, %cst_20 {dimension_numbers = #tpu.dot_dimension_numbers<[2], [1], [1], [2], [0, 0, 0, 1, 1, 2], [0], [0]>} : vector<2x8x8xf32>, vector<2x8x8xf32>, vector<2x8x8xf32> -> vector<2x8x8xf32>
    "tpu.trace_stop"() : () -> ()
    %67 = vector.extract_strided_slice %3 {offsets = [0, 0, 24], sizes = [2, 8, 8], strides = [1, 1, 1]} : vector<2x8x96xf32> to vector<2x8x8xf32>
    %cst_21 = arith.constant 0.353553385 : f32
    %68 = vector.broadcast %cst_21 : f32 to vector<2x8x8xf32>
    %69 = arith.mulf %67, %68 : vector<2x8x8xf32>
    %70 = vector.extract_strided_slice %3 {offsets = [0, 0, 56], sizes = [2, 8, 8], strides = [1, 1, 1]} : vector<2x8x96xf32> to vector<2x8x8xf32>
    %71 = vector.extract_strided_slice %3 {offsets = [0, 0, 88], sizes = [2, 8, 8], strides = [1, 1, 1]} : vector<2x8x96xf32> to vector<2x8x8xf32>
    "tpu.trace_start"() <{level = 10 : i32, message = "bqd,bkd->bqk"}> : () -> ()
    %cst_22 = arith.constant dense<0.000000e+00> : vector<2x8x8xf32>
    %72 = tpu.matmul %69, %70, %cst_22 {dimension_numbers = #tpu.dot_dimension_numbers<[2], [2], [1], [1], [0, 0, 0, 1, 1, 1], [0], [0]>} : vector<2x8x8xf32>, vector<2x8x8xf32>, vector<2x8x8xf32> -> vector<2x8x8xf32>
    %cst_23 = arith.constant -1.000000e+30 : f32
    "tpu.trace_stop"() : () -> ()
    %73 = vector.shape_cast %6 : vector<8x8xi1> to vector<1x8x8xi1>
    %74 = vector.broadcast %73 : vector<1x8x8xi1> to vector<2x8x8xi1>
    %75 = vector.broadcast %cst_23 : f32 to vector<2x8x8xf32>
    %76 = arith.select %74, %72, %75 : vector<2x8x8xi1>, vector<2x8x8xf32>
    %cst_24 = arith.constant dense<0xFF800000> : vector<2x8xf32>
    %77 = vector.multi_reduction <maximumf>, %76, %cst_24 [2] : vector<2x8x8xf32> to vector<2x8xf32>
    %78 = vector.shape_cast %77 : vector<2x8xf32> to vector<2x8x1xf32>
    %79 = vector.broadcast %78 : vector<2x8x1xf32> to vector<2x8x8xf32>
    %80 = arith.subf %76, %79 : vector<2x8x8xf32>
    %81 = math.exp %80 : vector<2x8x8xf32>
    %cst_25 = arith.constant dense<0.000000e+00> : vector<2x8xf32>
    %82 = vector.multi_reduction <add>, %81, %cst_25 [2] : vector<2x8x8xf32> to vector<2x8xf32>
    %83 = vector.shape_cast %82 : vector<2x8xf32> to vector<2x8x1xf32>
    %84 = vector.broadcast %83 : vector<2x8x1xf32> to vector<2x8x8xf32>
    %85 = arith.divf %81, %84 : vector<2x8x8xf32>
    "tpu.trace_start"() <{level = 10 : i32, message = "bqk,bkd->bqd"}> : () -> ()
    %cst_26 = arith.constant dense<0.000000e+00> : vector<2x8x8xf32>
    %86 = tpu.matmul %85, %71, %cst_26 {dimension_numbers = #tpu.dot_dimension_numbers<[2], [1], [1], [2], [0, 0, 0, 1, 1, 2], [0], [0]>} : vector<2x8x8xf32>, vector<2x8x8xf32>, vector<2x8x8xf32> -> vector<2x8x8xf32>
    "tpu.trace_stop"() : () -> ()
    %87 = tpu.concatenate %26, %46, %66, %86 in 2 : vector<2x8x8xf32>, vector<2x8x8xf32>, vector<2x8x8xf32>, vector<2x8x8xf32> -> vector<2x8x32xf32>
    %88 = vector.shape_cast %87 : vector<2x8x32xf32> to vector<16x32xf32>
    %c0_27 = arith.constant 0 : index
    %c0_28 = arith.constant 0 : index
    %89 = vector.load %arg3[%c0_27, %c0_28] : memref<32x32xf32, #tpu.memory_space<vmem>>, vector<32x32xf32>
    %cst_29 = arith.constant dense<0.000000e+00> : vector<16x32xf32>
    %90 = tpu.matmul %88, %89, %cst_29 {dimension_numbers = #tpu.dot_dimension_numbers<[1], [0], [0], [1], [0, 0, 1, 1], [], []>} : vector<16x32xf32>, vector<32x32xf32>, vector<16x32xf32> -> vector<16x32xf32>
    %c0_30 = arith.constant 0 : index
    %c0_31 = arith.constant 0 : index
    %91 = vector.load %arg4[%c0_30, %c0_31] : memref<1x32xf32, #tpu.memory_space<vmem>>, vector<1x32xf32>
    %92 = vector.broadcast %91 : vector<1x32xf32> to vector<16x32xf32>
    %93 = arith.addf %90, %92 : vector<16x32xf32>
    %c0_32 = arith.constant 0 : index
    %c0_33 = arith.constant 0 : index
    %94 = vector.load %arg5[%c0_32, %c0_33] : memref<16x32xf32, #tpu.memory_space<vmem>>, vector<16x32xf32>
    tpu.vector_store %arg5[%c0_32, %c0_33], %93 {strides = array<i32>} : memref<16x32xf32, #tpu.memory_space<vmem>>, vector<16x32xf32>,
    return
  }
  func.func @transform_0(%arg0: i32) -> (i32, i32) {
    %c0_i32 = arith.constant 0 : i32
    %c0_i32_0 = arith.constant 0 : i32
    return %arg0, %c0_i32 : i32, i32
  }
  func.func @transform_1(%arg0: i32) -> (i32, i32) {
    %c0_i32 = arith.constant 0 : i32
    %c0_i32_0 = arith.constant 0 : i32
    %c0_i32_1 = arith.constant 0 : i32
    return %c0_i32, %c0_i32_0 : i32, i32
  }
  func.func @transform_2(%arg0: i32) -> (i32, i32) {
    %c0_i32 = arith.constant 0 : i32
    %c0_i32_0 = arith.constant 0 : i32
    %c0_i32_1 = arith.constant 0 : i32
    return %c0_i32, %c0_i32_0 : i32, i32
  }
  func.func @transform_3(%arg0: i32) -> (i32, i32) {
    %c0_i32 = arith.constant 0 : i32
    %c0_i32_0 = arith.constant 0 : i32
    %c0_i32_1 = arith.constant 0 : i32
    return %c0_i32, %c0_i32_0 : i32, i32
  }
  func.func @transform_4(%arg0: i32) -> (i32, i32) {
    %c0_i32 = arith.constant 0 : i32
    %c0_i32_0 = arith.constant 0 : i32
    return %arg0, %c0_i32 : i32, i32
  }
}

</mosaic_0001>

<bundles_post_ra>
// kernel: tpu_custom_call.1
= control target key start
LH: loop header
LB: loop body
LE: loop exit
PB: predicated region body
PF: predicated region fallthrough
CT: control target
= control target key end

     0   :  { %9 = vsyncpa [#allocation3], 0  ;;  %s2855_s0 = inlined_call_operand.hbm [shape: f32[32,32], index: 0, kind: input, shape index: {}]   ;;  %s2856_s1 = inlined_call_operand.hbm [shape: f32[32,96], index: 1, kind: input, shape index: {}]   ;;  %s2857_s2 = inlined_call_operand.hbm [shape: f32[32,32], index: 2, kind: input, shape index: {}]   ;;  %s2858_s3 = inlined_call_operand.vmem [shape: f32[1,32], index: 3, kind: input, shape index: {}]   ;;  %s2859_s4 = inlined_call_operand.hbm [shape: f32[32,32], index: 4, kind: output, shape index: {}]  }
   0x1   :  { %11 = vsyncpa [#allocation3 + $0x1], 0 }
   0x2   :  { %12 = vsyncpa [#allocation6], 0 }
   0x3   :  { %13 = vsyncpa [#allocation4], 0 }
   0x4   :  { %15 = vsyncpa [#allocation4 + $0x1], 0  ;;  %s2440_s15 = smov 0   ;;  %s2442_s16 = smov 0  }
   0x5   :  { %s2444_s17 = smov 0   ;;  %s2446_s18 = smov 0  }
   0x6 LB: > { %s2461_s19 = sadd.s32 4294967295, %s2390_s18   ;;  %s1905_s20 = sadd.s32 4294967294, %s2390_s18   ;;  %s2390_s18 = sphi %s2446_s18, %s2881_s18   ;;  %s2386_s17 = sphi %s2444_s17, %s2880_s17   ;;  %s2382_s16 = sphi %s2442_s16, %s2879_s16   ;;  %s2378_s15 = sphi %s2440_s15, %s2878_s15  }
   0x7   : > { %p41_p0 = scmp.ne.s32.totalorder %s2382_s16, %s2378_s15  ;;  %p2860_p1 = scmp.eq.s32.totalorder %s2461_s19, 0 }
   0x8   : > { %p134_p3 = scmp.eq.s32.totalorder %s1905_s20, 1  ;;  %p1906_p5 = scmp.ge.s32.totalorder %s2390_s18, 1 }
   0x9   : > { %p2470_p4 = por %p2860_p1, %p41_p0  ;;  %p141_p7 = scmp.lt.s32.totalorder %s2390_s18, 3 }
   0xa   : > { %p2475_p6 = por %p134_p3, %p41_p0  ;;  %s2392_s24 = smov [#allocation5]  }
   0xb   : > { %s2863_s21 = scalar_select %p2470_p4, 1, 0 }
   0xc   : > { %s2864_s22 = scalar_select %p2475_p6, 1, 0 }
   0xd   : > { %p2480_p8 = pnand %p1906_p5, %p141_p7  ;;  %s153_s25 = sshll.u32 %s2392_s24, 4  ;;  %s2484_s25 = int_to_ptr.vmem [resolvable:$true] %s153_s25 }
   0xe   : > { %s2393_s27 = smov [#allocation7]   ;;  %s2234_s5 = scalar_lea.hbm %s2856_s1, 512 }
   0xf   : > { %p2128_p9 = pneg %p2480_p8  ;;  %s166_s28 = sshll.u32 %s2393_s27, 4  ;;  %s2495_s28 = int_to_ptr.vmem [resolvable:$true] %s166_s28 }
  0x10   : > { %p2235_p12 = scmp.ne.s32.totalorder %s2856_s1, %s2234_s5  ;;  %p2241_p5 = scmp.lt.u32.totalorder %s2234_s5, %s2856_s1 }
  0x11   : > { %p2491_p11 = pnand %p2128_p9, %p2860_p1 }
  0x13   : > { %p2236_p13 = pneg %p2491_p11 }
  0x15   : > { %p2237_p0 = pnand %p2236_p13, %p2235_p12 }
  0x17   : > { %p2238_p3 = pneg %p2237_p0 }
  0x19   : > { %p2243_p7 = pnand %p2241_p5, %p2238_p3 }
  0x1b   : > { %2246 = shalt.err (!%p2243_p7)
}
  0x1c   : > { %s2247_s10 = scalar_lea.vmem %s2484_s25, 512  ;;  %p2255_p2 = scmp.lt.s32.totalorder %s2484_s25, %s2484_s25 }
  0x1d   : > { %p2248_p9 = scmp.ne.s32.totalorder %s2484_s25, %s2247_s10  ;;  %p2256_p12 = scmp.lt.s32.totalorder %s2247_s10, %s2247_s10 }
  0x1f   : > { %p2250_p10 = pnand %p2248_p9, %p2236_p13  ;;  %p2257_p0 = por %p2256_p12, %p2255_p2 }
  0x21   : > { %p2251_p1 = pneg %p2250_p10 }
  0x23   : > { %p2258_p6 = pnand %p2257_p0, %p2251_p1 }
  0x25   : > { %2261 = shalt.err (!%p2258_p6)
}
  0x26   : > { %s2394_s11 = smov 128   ;;  %s2395_s12 = smov 8  }
  0x27   : > { %2131 = dma.hbm_to_vmem [thread:$0]  (!%p2491_p11), %s2856_s1, 512, %s2484_s25, [#allocation6], %s2394_s11, %s2394_s11, %s2395_s12  }
  0x28   : > { %s2262_s27 = scalar_lea.hbm %s2857_s2, 512 }
  0x29   : > { %p2263_p1 = scmp.ne.s32.totalorder %s2857_s2, %s2262_s27  ;;  %p2269_p10 = scmp.lt.u32.totalorder %s2262_s27, %s2857_s2 }
  0x2b   : > { %p2265_p2 = pnand %p2263_p1, %p2236_p13 }
  0x2d   : > { %p2266_p6 = pneg %p2265_p2 }
  0x2f   : > { %p2271_p3 = pnand %p2269_p10, %p2266_p6 }
  0x31   : > { %2274 = shalt.err (!%p2271_p3)
}
  0x32   : > { %s2275_s25 = scalar_lea.vmem %s2495_s28, 512  ;;  %p2283_p12 = scmp.lt.s32.totalorder %s2495_s28, %s2495_s28 }
  0x33   : > { %p2276_p5 = scmp.ne.s32.totalorder %s2495_s28, %s2275_s25  ;;  %p2284_p0 = scmp.lt.s32.totalorder %s2275_s25, %s2275_s25 }
  0x35   : > { %p2278_p7 = pnand %p2276_p5, %p2236_p13  ;;  %p2285_p1 = por %p2284_p0, %p2283_p12 }
  0x37   : > { %p2279_p9 = pneg %p2278_p7 }
  0x39   : > { %p2286_p2 = pnand %p2285_p1, %p2279_p9 }
  0x3b   : > { %2289 = shalt.err (!%p2286_p2)
}
  0x3c   : > { %2134 = dma.hbm_to_vmem [thread:$0]  (!%p2491_p11), %s2857_s2, 512, %s2495_s28, [#allocation6], %s2394_s11, %s2394_s11, %s2395_s12  }
  0x3d   : > { %s2556_s26 = sadd.s32 1, %s2390_s18   ;;  %s28_s9 = sadd.s32 1, %s2386_s17 }
  0x3e   : > { %s25_s10 = ssub.s32 %s2390_s18, %s2556_s26  ;;  %p35_p13 = scmp.ne.s32.totalorder %s2386_s17, %s2382_s16 }
  0x3f   : > { %p26_p6 = scmp.eq.s32.totalorder %s25_s10, 0  ;;  %p36_p10 = scmp.eq.s32.totalorder %s2390_s18, 0 }
  0x40   : > { %p2867_p3 = scmp.eq.s32.totalorder %s2461_s19, 1  ;;  %p2145_p7 = scmp.lt.s32.totalorder %s2390_s18, 2 }
  0x41   : > { %s2572_s14 = scalar_select %p26_p6, %s2386_s17, %s28_s9  }
  0x42   : > { %p2566_p5 = por %p2867_p3, %p35_p13  ;;  %p37_p9 = por %p36_p10, %p35_p13 }
  0x43   : > { %s183_s20 = sand.u32 1, %s2386_s17   ;;  %s1952_s28 = sshll.u32 %s2390_s18, 8 }
  0x44   : > { %s2868_s13 = scalar_select %p2566_p5, 1, 0 }
  0x45   : > { %s1910_s24 = sshll.u32 %s183_s20, 4  ;;  %s2579_s30 = scalar_lea.hbm %s2855_s0, %s1952_s28 }
  0x46   : > { %s187_s5 = scalar_lea.vmem [#allocation2], %s1910_s24  ;;  %p2583_p11 = pnand %p2145_p7, %p37_p9 }
  0x47   : > { %s194_s6 = sshll.u32 %s187_s5, 4  ;;  %s2587_s7 = scalar_lea.sflag [#allocation3], %s183_s20  ;;  %s2581_s6 = int_to_ptr.vmem [resolvable:$true] %s194_s6 }
  0x48   : > { %s2290_s8 = scalar_lea.hbm %s2579_s30, 256  ;;  %p2292_p0 = pneg %p2583_p11 }
  0x49   : > { %p2291_p12 = scmp.ne.s32.totalorder %s2579_s30, %s2290_s8  ;;  %s2295_s24 = scalar_lea.hbm %s2855_s0, 512 }
  0x4a   : > { %p2296_p13 = scmp.lt.u32.totalorder %s2579_s30, %s2855_s0  ;;  %p2297_p6 = scmp.lt.u32.totalorder %s2295_s24, %s2290_s8 }
  0x4b   : > { %p2293_p1 = pnand %p2292_p0, %p2291_p12  ;;  %p2299_p3 = scmp.lt.u32.totalorder %s2290_s8, %s2579_s30 }
  0x4c   : > { %p2298_p10 = por %p2297_p6, %p2296_p13 }
  0x4d   : > { %p2294_p2 = pneg %p2293_p1 }
  0x4e   : > { %p2300_p7 = por %p2299_p3, %p2298_p10 }
  0x50   : > { %p2301_p9 = pnand %p2300_p7, %p2294_p2 }
  0x52   : > { %2304 = shalt.err (!%p2301_p9)
}
  0x53   : > { %s2305_s20 = scalar_lea.vmem %s2581_s6, 256  ;;  %s2396_s29 = smov [#allocation2]  }
  0x54   : > { %p2306_p12 = scmp.ne.s32.totalorder %s2581_s6, %s2305_s20  ;;  %s2310_s5 = sshll.u32 %s2396_s29, 4  ;;  %s2311_s5 = int_to_ptr.vmem [resolvable:$false] %s2310_s5 }
  0x55   : > { %s2312_s9 = scalar_lea.vmem %s2311_s5, 512  ;;  %p2313_p4 = scmp.lt.s32.totalorder %s2581_s6, %s2311_s5 }
  0x56   : > { %p2308_p1 = pnand %p2306_p12, %p2292_p0  ;;  %p2314_p13 = scmp.lt.s32.totalorder %s2312_s9, %s2305_s20 }
  0x58   : > { %p2309_p5 = pneg %p2308_p1  ;;  %p2315_p6 = por %p2314_p13, %p2313_p4 }
  0x5a   : > { %p2316_p10 = pnand %p2315_p6, %p2309_p5 }
  0x5c   : > { %2319 = shalt.err (!%p2316_p10)
}
  0x5d   : > { %2138 = dma.hbm_to_vmem [thread:$0]  (!%p2583_p11), %s2579_s30, 256, %s2581_s6, %s2587_s7, %s2394_s11, %s2394_s11, %s2395_s12  }
  0x5e   : > { %206 = sbr.rel (%p2480_p8) target bundleno = 3173 (0xc65), region = 36  ;;  %s2621_s8 = sand.u32 (!%p2480_p8), 1, %s2382_s16  }
  0x5f   : > { %s1914_s10 = sshll.u32 (!%p2480_p8), %s2621_s8, 4  ;;  %s209_s24 = scalar_lea.sflag (!%p2480_p8), [#allocation3], %s2621_s8 }
  0x60   : > { %s212_s25 = scalar_lea.vmem (!%p2480_p8), [#allocation2], %s1914_s10  ;;  %p2870_p4 = scmp.ne.s32.totalorder (!%p2480_p8), %s2863_s21, 0 }
  0x65   : > { %2365 = dma.done.wait (%p2870_p4), %s209_s24, 256  }
  0x66   : > { %2367 = vsyncadd (%p2870_p4), %s209_s24, 4294967040  ;;  %p2871_p5 = scmp.eq.s32.totalorder %s2461_s19, 0 }
  0x68   : > { %2369 = dma.done.wait (%p2871_p5), [#allocation6], 1024   ;;  %p2872_p8 = pmov %p2871_p5 }
  0x69   : > { %vm253_vm0 = vcmask 261120   ;;  %v249_v0 = vld [vmem:[#allocation5] sm:$0xff]  ;;  %v250_v1 = vld [vmem:[#allocation5 + $0x8] sm:$0xff]  ;;  %v251_v2 = vld [vmem:[#allocation5 + $0x10] sm:$0xff]  ;;  %v2397_v8 = vmov 0.0   ;;  %vm2398_vm1 = vmmov 0   ;;  %v335_v15 = vlaneseq }
  0x6a   : > { %2371 = vsyncadd (%p2872_p8), [#allocation6], 4294966272  ;;  %v2100_v3 = vpack.c.bf16 %v250_v1, %v249_v0  ;;  %v252_v4 = vld [vmem:[#allocation5 + $0x18] sm:$0xff]  ;;  %v247_v5 = vld [vmem:[%s212_s25] sm:$0xff]  ;;  %2009 = vmatprep.subr.mxu1 %v2397_v8  ;;  %2011 = vmatprep.mubr.msk.f32.mxu1 %vm2398_vm1, %v2397_v8  ;;  %s2399_s21 = smov 96   ;;  %vm345_vm2 = vcmask 64512  }
  0x6b   : > { %v2104_v6 = vpack.c.bf16 %v252_v4, %v251_v2  ;;  %2006 = vmatprep.mubr.msk.f32.mxu0 %vm253_vm0, %v247_v5  ;;  %v248_v7 = vld [vmem:[%s212_s25 + $0x8] sm:$0xff]  ;;  %v336_v16 = vshrl.u32 %v335_v15, 7  ;;  %v338_v17 = vand.u32 127, %v335_v15  ;;  %s2400_s23 = smov 64   ;;  %s2401_s11 = smov 88   ;;  %vm1702_vm4 = vcmask 195584  }
  0x6c   : > { %2101 = vmatprep.subr.bf16.mxu0 %v2100_v3  ;;  %s2402_s12 = smov 120   ;;  %s2403_s30 = smov 56   ;;  %vm1699_vm5 = vcmask 130048  }
  0x6d   : > { %2103 = vmatpush3.bf16.msra.mxu0 %v2100_v3  ;;  %vm2667_vm3 = vcmp.le.s32.totalorder %v338_v17, %v336_v16  ;;  %s2404_s6 = smov 112   ;;  %s2405_s7 = smov 80  }
  0x6e   : > { %2105 = vmatprep.subr.bf16.mxu0 %v2104_v6  ;;  %s2406_s28 = smov 48   ;;  %s2407_s27 = smov 72  }
  0x6f   : > { %s2408_s20 = smov 104   ;;  %s2409_s29 = smov 40  }
  0x70   : > { %s2410_s5 = smov 8   ;;  %s2411_s9 = smov 16  }
  0x71   : > { %2107 = vmatpush3.bf16.msra.mxu0 %v2104_v6  ;;  %s2412_s24 = smov 24   ;;  %p2875_p0 = scmp.ne.s32.totalorder %s2868_s13, 0 }
  0x72   : > { %2029 = vmatprep.subr.mxu0 %v2397_v8 }
  0x74   : > { %2007 = vmatmul.mubr.msk.f32.vlgmr.msra.gmra.mrb[0].mxu0 %vm253_vm0, %v248_v7 }
  0x75   : > { %2031 = vmatprep.mubr.msk.f32.mxu0 %vm2398_vm1, %v2397_v8 }
 0x147   : > { %v2643_v9 = vpop.f32.mrb[0].mxu0 }
 0x148   : > { %v2645_v10 = vpop.f32.mrb[1].mxu0  ;;  %v2660_v14 = vmul.f32 0.35355338, %v2643_v9 }
 0x149   : > { %343 = vrot.lane.b32.xlu0 %v2645_v10, %s2399_s21  ;;  %v2652_v12 = vmul.f32 0.35355338, %v2645_v10 }
 0x14d   : > { %422 = vrot.lane.b32.xlu0 %v2643_v9, %s2399_s21 }
 0x1bb   : > { %v344_v11 = vpop.permute.xlu0 %343 }
 0x1bc   : > { %2010 = vmatpush3.xpose.msk.msra.mxu1 %vm345_vm2, %v344_v11 }
 0x1bd   : > { %2014 = vmatprep.subr.mxu1 %v2397_v8 }
 0x1bf   : > { %v423_v13 = vpop.permute.xlu0 %422  ;;  %2012 = vmatmul.mubr.msk.f32.vlgmr.msra.gmra.mrb[0].mxu1 %vm345_vm2, %v2652_v12 }
 0x1c0   : > { %2015 = vmatpush3.xpose.msk.msra.mxu1 %vm345_vm2, %v423_v13  ;;  %2016 = vmatprep.mubr.msk.f32.mxu1 %vm2398_vm1, %v2397_v8 }
 0x1c1   : > { %2019 = vmatprep.subr.mxu1 %v2397_v8 }
 0x1c3   : > { %2017 = vmatmul.mubr.msk.f32.vlgmr.msra.gmra.mrb[2].mxu1 %vm345_vm2, %v2660_v14 }
 0x1c4   : > { %2021 = vmatprep.mubr.msk.f32.mxu1 %vm2398_vm1, %v2397_v8 }
 0x292   : > { %v417_v19 = vpop.f32.mrb[0].mxu1 }
 0x293   : > { %v501_v20 = vsel %vm2667_vm3, %v417_v19, -1e+30  ;;  %v2013_v21 = vpop.f32.mrb[1].mxu1 }
 0x294   : > { %v503_v22 = vsel %vm345_vm2, %v501_v20, -inf }
 0x295   : > { %504 = vmax.xlane.f32.xlu1 %v503_v22 }
 0x296   : > { %v495_v23 = vpop.f32.mrb[2].mxu1 }
 0x297   : > { %v502_v24 = vsel %vm2667_vm3, %v495_v23, -1e+30  ;;  %v2018_v25 = vpop.f32.mrb[3].mxu1 }
 0x298   : > { %v506_v26 = vsel %vm345_vm2, %v502_v24, -inf }
 0x299   : > { %507 = vmax.xlane.f32.xlu1 %v506_v26 }
 0x2aa   : > { %525 = vrot.lane.b32.xlu1 %v2645_v10, %s2400_s23 }
 0x2ae   : > { %601 = vrot.lane.b32.xlu1 %v2643_v9, %s2400_s23  ;;  %s244_s23 = scalar_lea.vmem [#allocation8], %s1914_s10  ;;  %s1800_s10 = scalar_lea.sflag [#allocation4], %s2621_s8 }
 0x2b2   : > { %679 = vrot.lane.b32.xlu1 %v2645_v10, %s2401_s11 }
 0x2b6   : > { %757 = vrot.lane.b32.xlu1 %v2643_v9, %s2401_s11  ;;  %s1813_s11 = sshll.u32 %s244_s23, 4  ;;  %s2803_s11 = int_to_ptr.vmem [resolvable:$true] %s1813_s11 }
 0x322   : > { %v505_v27 = vpop.xlane.xlu1 %504 }
 0x323   : > { %v509_v28 = vsub.f32 %v501_v20, %v505_v27 }
 0x325   : > { %v511_v29 = vmul.f32 1.442695, %v509_v28 }
 0x326   : > { %v508_v30 = vpop.xlane.xlu1 %507 }
 0x327   : > { %2202 = vpow2.f32 %v511_v29  ;;  %v510_v31 = vsub.f32 %v502_v24, %v508_v30 }
 0x329   : > { %v513_v32 = vmul.f32 1.442695, %v510_v31 }
 0x32a   : > { %v526_v33 = vpop.permute.xlu1 %525 }
 0x32b   : > { %2204 = vpow2.f32 %v513_v32  ;;  %2020 = vmatpush3.msra.mxu1 %v526_v33 }
 0x32c   : > { %2024 = vmatprep.subr.mxu1 %v2397_v8 }
 0x32e   : > { %v602_v34 = vpop.permute.xlu1 %601 }
 0x331   : > { %v2203_v35 = vpop.eup %2202 }
 0x332   : > { %v680_v36 = vpop.permute.xlu1 %679  ;;  %v515_v37 = vsel %vm345_vm2, %v2203_v35, 0.0 }
 0x333   : > { %516 = vadd.xlane.f32.xlu0 %v515_v37  ;;  %2030 = vmatpush3.xpose.msk.msra.mxu0 %vm345_vm2, %v680_v36 }
 0x334   : > { %2039 = vmatprep.subr.mxu0 %v2397_v8 }
 0x335   : > { %v2205_v38 = vpop.eup %2204 }
 0x336   : > { %v518_v39 = vsel %vm345_vm2, %v2205_v38, 0.0  ;;  %v758_v40 = vpop.permute.xlu1 %757 }
 0x337   : > { %519 = vadd.xlane.f32.xlu1 %v518_v39 }
 0x348   : > { %755 = vrot.lane.b32.xlu1 %v2660_v14, %s2402_s12 }
 0x349   : > { %677 = vrot.lane.b32.xlu0 %v2652_v12, %s2402_s12  ;;  %s1953_s12 = sshll.u32 %s2461_s19, 8  ;;  %s2320_s19 = scalar_lea.vmem %s2803_s11, 256 }
 0x34a   : > { %p2321_p11 = scmp.ne.s32.totalorder %s2803_s11, %s2320_s19 }
 0x34c   : > { %p2322_p2 = pnand %p2321_p11, %p2875_p0 }
 0x34e   : > { %p2323_p3 = pneg %p2322_p2 }
 0x3c0   : > { %v517_v41 = vpop.xlane.xlu0 %516 }
 0x3c1   : > { %2206 = vrcp.f32 %v517_v41 }
 0x3c4   : > { %v678_v42 = vpop.permute.xlu0 %677  ;;  %v520_v43 = vpop.xlane.xlu1 %519 }
 0x3c5   : > { %2208 = vrcp.f32 %v520_v43  ;;  %2032 = vmatmul.mubr.msk.f32.vlgmr.msra.gmra.mrb[2].mxu0 %vm345_vm2, %v678_v42 }
 0x3c6   : > { %2041 = vmatprep.mubr.msk.f32.mxu0 %vm2398_vm1, %v2397_v8 }
 0x3c8   : > { %v756_v48 = vpop.permute.xlu1 %755 }
 0x3cb   : > { %v2207_v44 = vpop.eup %2206 }
 0x3cc   : > { %v522_v45 = vmul.f32 %v2207_v44, %v2203_v35 }
 0x3ce   : > { %2022 = vmatmul.mubr.msk.f32.vlgmr.msra.gmra.mrb[4].mxu1 %vm345_vm2, %v522_v45 }
 0x3cf   : > { %v2209_v46 = vpop.eup %2208  ;;  %2025 = vmatpush3.msra.mxu1 %v602_v34  ;;  %2026 = vmatprep.mubr.msk.f32.mxu1 %vm2398_vm1, %v2397_v8 }
 0x3d0   : > { %v524_v47 = vmul.f32 %v2209_v46, %v2205_v38  ;;  %2034 = vmatprep.subr.mxu1 %v2397_v8 }
 0x3d2   : > { %2027 = vmatmul.mubr.msk.f32.vlgmr.msra.gmra.mrb[6].mxu1 %vm345_vm2, %v524_v47 }
 0x3d3   : > { %2036 = vmatprep.mubr.msk.f32.mxu1 %vm2398_vm1, %v2397_v8 }
 0x3d6   : > { %2035 = vmatpush3.xpose.msk.msra.mxu1 %vm345_vm2, %v758_v40 }
 0x3d7   : > { %2044 = vmatprep.subr.mxu1 %v2397_v8 }
 0x3d9   : > { %2037 = vmatmul.mubr.msk.f32.vlgmr.msra.gmra.mrb[8].mxu1 %vm345_vm2, %v756_v48 }
 0x3da   : > { %2046 = vmatprep.mubr.msk.f32.mxu1 %vm2398_vm1, %v2397_v8 }
 0x498   : > { %v751_v49 = vpop.f32.mrb[2].mxu0 }
 0x499   : > { %v833_v50 = vsel %vm2667_vm3, %v751_v49, -1e+30  ;;  %v2033_v51 = vpop.f32.mrb[3].mxu0 }
 0x49a   : > { %v835_v52 = vsel %vm345_vm2, %v833_v50, -inf }
 0x49b   : > { %836 = vmax.xlane.f32.xlu1 %v835_v52 }
 0x4a1   : > { %v2706_v53 = vpop.f32.mrb[4].mxu1 }
 0x4a2   : > { %v2023_v54 = vpop.f32.mrb[5].mxu1 }
 0x4a5   : > { %v2708_v55 = vpop.f32.mrb[6].mxu1 }
 0x4a6   : > { %v2028_v56 = vpop.f32.mrb[7].mxu1 }
 0x4ac   : > { %v829_v57 = vpop.f32.mrb[8].mxu1 }
 0x4ad   : > { %v834_v58 = vsel %vm2667_vm3, %v829_v57, -1e+30  ;;  %v2038_v59 = vpop.f32.mrb[9].mxu1 }
 0x4ae   : > { %v838_v60 = vsel %vm345_vm2, %v834_v58, -inf }
 0x4af   : > { %839 = vmax.xlane.f32.xlu0 %v838_v60 }
 0x4c5   : > { %933 = vrot.lane.b32.xlu0 %v2643_v9, %s2403_s30 }
 0x4c9   : > { %1009 = vrot.lane.b32.xlu0 %v2652_v12, %s2404_s6 }
 0x528   : > { %v837_v61 = vpop.xlane.xlu1 %836 }
 0x529   : > { %v841_v62 = vsub.f32 %v833_v50, %v837_v61 }
 0x52b   : > { %v843_v63 = vmul.f32 1.442695, %v841_v62 }
 0x52d   : > { %2210 = vpow2.f32 %v843_v63 }
 0x537   : > { %v2211_v0 = vpop.eup %2210 }
 0x538   : > { %v847_v1 = vsel %vm345_vm2, %v2211_v0, 0.0 }
 0x539   : > { %848 = vadd.xlane.f32.xlu1 %v847_v1 }
 0x53c   : > { %v840_v2 = vpop.xlane.xlu0 %839 }
 0x53d   : > { %v842_v4 = vsub.f32 %v834_v58, %v840_v2 }
 0x53f   : > { %v845_v5 = vmul.f32 1.442695, %v842_v4 }
 0x540   : > { %v934_v3 = vpop.permute.xlu0 %933 }
 0x541   : > { %2045 = vmatpush3.msra.mxu1 %v934_v3  ;;  %2212 = vpow2.f32 %v845_v5 }
 0x542   : > { %2054 = vmatprep.subr.mxu1 %v2397_v8 }
 0x544   : > { %v1010_v19 = vpop.permute.xlu0 %1009 }
 0x54a   : > { %857 = vrot.lane.b32.xlu1 %v2645_v10, %s2403_s30 }
 0x54b   : > { %v2213_v6 = vpop.eup %2212 }
 0x54c   : > { %v850_v7 = vsel %vm345_vm2, %v2213_v6, 0.0 }
 0x54e   : > { %1011 = vrot.lane.b32.xlu1 %v2645_v10, %s2405_s7 }
 0x552   : > { %1089 = vrot.lane.b32.xlu1 %v2643_v9, %s2405_s7  ;;  %s2808_s7 = scalar_lea.hbm %s2859_s4, %s1953_s12 }
 0x576   : > { %851 = vadd.xlane.f32.xlu1 %v850_v7 }
 0x587   : > { %1087 = vrot.lane.b32.xlu1 %v2660_v14, %s2404_s6 }
 0x5c6   : > { %v849_v11 = vpop.xlane.xlu1 %848 }
 0x5c7   : > { %2214 = vrcp.f32 %v849_v11 }
 0x5ca   : > { %v858_v13 = vpop.permute.xlu1 %857 }
 0x5cb   : > { %2040 = vmatpush3.msra.mxu0 %v858_v13 }
 0x5cc   : > { %2049 = vmatprep.subr.mxu0 %v2397_v8 }
 0x5ce   : > { %v1012_v17 = vpop.permute.xlu1 %1011 }
 0x5d1   : > { %v2215_v15 = vpop.eup %2214 }
 0x5d2   : > { %v854_v16 = vmul.f32 %v2215_v15, %v2211_v0  ;;  %v1090_v20 = vpop.permute.xlu1 %1089 }
 0x5d4   : > { %2042 = vmatmul.mubr.msk.f32.vlgmr.msra.gmra.mrb[4].mxu0 %vm345_vm2, %v854_v16 }
 0x5d5   : > { %2050 = vmatpush3.xpose.msk.msra.mxu0 %vm345_vm2, %v1012_v17  ;;  %2051 = vmatprep.mubr.msk.f32.mxu0 %vm2398_vm1, %v2397_v8 }
 0x5d6   : > { %2059 = vmatprep.subr.mxu0 %v2397_v8 }
 0x5d8   : > { %2052 = vmatmul.mubr.msk.f32.vlgmr.msra.gmra.mrb[6].mxu0 %vm345_vm2, %v1010_v19 }
 0x5d9   : > { %2061 = vmatprep.mubr.msk.f32.mxu0 %vm2398_vm1, %v2397_v8 }
 0x603   : > { %v852_v21 = vpop.xlane.xlu1 %851 }
 0x604   : > { %2216 = vrcp.f32 %v852_v21 }
 0x607   : > { %v1088_v24 = vpop.permute.xlu1 %1087 }
 0x60e   : > { %v2217_v22 = vpop.eup %2216 }
 0x60f   : > { %v856_v23 = vmul.f32 %v2217_v22, %v2213_v6 }
 0x611   : > { %2047 = vmatmul.mubr.msk.f32.vlgmr.msra.gmra.mrb[10].mxu1 %vm345_vm2, %v856_v23 }
 0x612   : > { %2055 = vmatpush3.xpose.msk.msra.mxu1 %vm345_vm2, %v1090_v20  ;;  %2056 = vmatprep.mubr.msk.f32.mxu1 %vm2398_vm1, %v2397_v8 }
 0x613   : > { %2064 = vmatprep.subr.mxu1 %v2397_v8 }
 0x615   : > { %2057 = vmatmul.mubr.msk.f32.vlgmr.msra.gmra.mrb[12].mxu1 %vm345_vm2, %v1088_v24 }
 0x616   : > { %2066 = vmatprep.mubr.msk.f32.mxu1 %vm2398_vm1, %v2397_v8 }
 0x6a7   : > { %v2739_v25 = vpop.f32.mrb[4].mxu0 }
 0x6a8   : > { %v2043_v26 = vpop.f32.mrb[5].mxu0 }
 0x6ab   : > { %v1083_v27 = vpop.f32.mrb[6].mxu0 }
 0x6ac   : > { %v1165_v28 = vsel %vm2667_vm3, %v1083_v27, -1e+30  ;;  %v2053_v29 = vpop.f32.mrb[7].mxu0 }
 0x6ad   : > { %v1167_v30 = vsel %vm345_vm2, %v1165_v28, -inf  ;;  %v1706_v29 = vld [vmem:[#allocation7 + $0x8] sm:$0xff] }
 0x6ae   : > { %1168 = vmax.xlane.f32.xlu0 %v1167_v30  ;;  %v1707_v30 = vld [vmem:[#allocation7 + $0x10] sm:$0xff] }
 0x6e4   : > { %v2744_v31 = vpop.f32.mrb[10].mxu1 }
 0x6e5   : > { %v2048_v32 = vpop.f32.mrb[11].mxu1 }
 0x6e8   : > { %v1161_v33 = vpop.f32.mrb[12].mxu1 }
 0x6e9   : > { %v1166_v34 = vsel %vm2667_vm3, %v1161_v33, -1e+30  ;;  %v2058_v35 = vpop.f32.mrb[13].mxu1 }
 0x6ea   : > { %v1170_v36 = vsel %vm345_vm2, %v1166_v34, -inf }
 0x6eb   : > { %1171 = vmax.xlane.f32.xlu1 %v1170_v36 }
 0x6fc   : > { %1189 = vrot.lane.b32.xlu1 %v2645_v10, %s2406_s28 }
 0x700   : > { %1343 = vrot.lane.b32.xlu1 %v2645_v10, %s2407_s27 }
 0x704   : > { %1421 = vrot.lane.b32.xlu1 %v2643_v9, %s2407_s27 }
 0x708   : > { %1419 = vrot.lane.b32.xlu1 %v2660_v14, %s2408_s20 }
 0x73b   : > { %v1169_v37 = vpop.xlane.xlu0 %1168 }
 0x73c   : > { %v1173_v38 = vsub.f32 %v1165_v28, %v1169_v37  ;;  %v1705_v28 = vld [vmem:[#allocation7] sm:$0xff] }
 0x73e   : > { %v1175_v39 = vmul.f32 1.442695, %v1173_v38 }
 0x740   : > { %2218 = vpow2.f32 %v1175_v39 }
 0x74a   : > { %v2219_v40 = vpop.eup %2218 }
 0x74b   : > { %v1179_v41 = vsel %vm345_vm2, %v2219_v40, 0.0 }
 0x74c   : > { %1180 = vadd.xlane.f32.xlu0 %v1179_v41 }
 0x762   : > { %1265 = vrot.lane.b32.xlu0 %v2643_v9, %s2406_s28  ;;  %s2413_s28 = smov [#allocation8]  }
 0x763   : > { %s2324_s27 = sshll.u32 %s2413_s28, 4  ;;  %s2325_s27 = int_to_ptr.vmem [resolvable:$false] %s2324_s27 }
 0x764   : > { %p2327_p7 = scmp.lt.s32.totalorder %s2803_s11, %s2325_s27 }
 0x778   : > { %v1172_v42 = vpop.xlane.xlu1 %1171 }
 0x779   : > { %v1174_v43 = vsub.f32 %v1166_v34, %v1172_v42 }
 0x77b   : > { %v1177_v44 = vmul.f32 1.442695, %v1174_v43 }
 0x77c   : > { %v1190_v45 = vpop.permute.xlu1 %1189 }
 0x77d   : > { %2220 = vpow2.f32 %v1177_v44  ;;  %2060 = vmatpush3.msra.mxu0 %v1190_v45 }
 0x77e   : > { %2069 = vmatprep.subr.mxu0 %v2397_v8 }
 0x780   : > { %v1344_v51 = vpop.permute.xlu1 %1343 }
 0x784   : > { %v1422_v56 = vpop.permute.xlu1 %1421 }
 0x787   : > { %v2221_v46 = vpop.eup %2220 }
 0x788   : > { %v1182_v14 = vsel %vm345_vm2, %v2221_v46, 0.0  ;;  %v1420_v58 = vpop.permute.xlu1 %1419 }
 0x789   : > { %1183 = vadd.xlane.f32.xlu0 %v1182_v14 }
 0x79f   : > { %1341 = vrot.lane.b32.xlu0 %v2652_v12, %s2408_s20  ;;  %s2326_s20 = scalar_lea.vmem %s2325_s27, 512 }
 0x7a0   : > { %p2328_p9 = scmp.lt.s32.totalorder %s2326_s20, %s2320_s19 }
 0x7a2   : > { %p2329_p12 = por %p2328_p9, %p2327_p7 }
 0x7a4   : > { %p2330_p1 = pnand %p2329_p12, %p2323_p3 }
 0x7d9   : > { %v1181_v47 = vpop.xlane.xlu0 %1180 }
 0x7da   : > { %2222 = vrcp.f32 %v1181_v47 }
 0x7dd   : > { %v1266_v48 = vpop.permute.xlu0 %1265 }
 0x7de   : > { %2065 = vmatpush3.msra.mxu1 %v1266_v48 }
 0x7df   : > { %2074 = vmatprep.subr.mxu1 %v2397_v8 }
 0x7e4   : > { %v2223_v49 = vpop.eup %2222 }
 0x7e5   : > { %v1186_v50 = vmul.f32 %v2223_v49, %v2219_v40 }
 0x7e7   : > { %2062 = vmatmul.mubr.msk.f32.vlgmr.msra.gmra.mrb[8].mxu0 %vm345_vm2, %v1186_v50 }
 0x7e8   : > { %2070 = vmatpush3.xpose.msk.msra.mxu0 %vm345_vm2, %v1344_v51  ;;  %2071 = vmatprep.mubr.msk.f32.mxu0 %vm2398_vm1, %v2397_v8 }
 0x7e9   : > { %2079 = vmatprep.subr.mxu0 %v2397_v8 }
 0x816   : > { %v1184_v52 = vpop.xlane.xlu0 %1183 }
 0x817   : > { %2224 = vrcp.f32 %v1184_v52 }
 0x81a   : > { %v1342_v12 = vpop.permute.xlu0 %1341 }
 0x81b   : > { %2072 = vmatmul.mubr.msk.f32.vlgmr.msra.gmra.mrb[10].mxu0 %vm345_vm2, %v1342_v12 }
 0x81c   : > { %2081 = vmatprep.mubr.msk.f32.mxu0 %vm2398_vm1, %v2397_v8 }
 0x821   : > { %v2225_v54 = vpop.eup %2224 }
 0x822   : > { %v1188_v57 = vmul.f32 %v2225_v54, %v2221_v46 }
 0x824   : > { %2067 = vmatmul.mubr.msk.f32.vlgmr.msra.gmra.mrb[14].mxu1 %vm345_vm2, %v1188_v57 }
 0x825   : > { %2075 = vmatpush3.xpose.msk.msra.mxu1 %vm345_vm2, %v1422_v56  ;;  %2076 = vmatprep.mubr.msk.f32.mxu1 %vm2398_vm1, %v2397_v8 }
 0x826   : > { %2084 = vmatprep.subr.mxu1 %v2397_v8 }
 0x828   : > { %2077 = vmatmul.mubr.msk.f32.vlgmr.msra.gmra.mrb[16].mxu1 %vm345_vm2, %v1420_v58 }
 0x829   : > { %2086 = vmatprep.mubr.msk.f32.mxu1 %vm2398_vm1, %v2397_v8 }
 0x8ba   : > { %v1261_v59 = vpop.f32.mrb[8].mxu0 }
 0x8bb   : > { %v2063_v60 = vpop.f32.mrb[9].mxu0 }
 0x8ee   : > { %v1415_v61 = vpop.f32.mrb[10].mxu0 }
 0x8ef   : > { %v1497_v62 = vsel %vm2667_vm3, %v1415_v61, -1e+30  ;;  %v2073_v63 = vpop.f32.mrb[11].mxu0 }
 0x8f0   : > { %v1499_v0 = vsel %vm345_vm2, %v1497_v62, -inf }
 0x8f1   : > { %1500 = vmax.xlane.f32.xlu0 %v1499_v0 }
 0x8f7   : > { %v1337_v1 = vpop.f32.mrb[14].mxu1 }
 0x8f8   : > { %v2068_v2 = vpop.f32.mrb[15].mxu1 }
 0x8fb   : > { %v1493_v3 = vpop.f32.mrb[16].mxu1 }
 0x8fc   : > { %v1498_v4 = vsel %vm2667_vm3, %v1493_v3, -1e+30  ;;  %v2078_v5 = vpop.f32.mrb[17].mxu1 }
 0x8fd   : > { %v1502_v6 = vsel %vm345_vm2, %v1498_v4, -inf }
 0x8fe   : > { %1503 = vmax.xlane.f32.xlu1 %v1502_v6 }
 0x90f   : > { %1521 = vrot.lane.b32.xlu1 %v2645_v10, %s2409_s29 }
 0x913   : > { %1675 = vrot.lane.b32.xlu1 %v2739_v25, %s2410_s5 }
 0x917   : > { %1677 = vrot.lane.b32.xlu1 %v2744_v31, %s2410_s5  ;;  %v2108_v31 = vpack.c.bf16 %v1706_v29, %v1705_v28 }
 0x91b   : > { %1685 = vrot.lane.b32.xlu1 %v1337_v1, %s2411_s9 }
 0x97e   : > { %v1501_v8 = vpop.xlane.xlu0 %1500 }
 0x97f   : > { %v1505_v7 = vsub.f32 %v1497_v62, %v1501_v8 }
 0x981   : > { %v1507_v18 = vmul.f32 1.442695, %v1505_v7 }
 0x983   : > { %2226 = vpow2.f32 %v1507_v18 }
 0x98b   : > { %v1504_v11 = vpop.xlane.xlu1 %1503 }
 0x98c   : > { %v1506_v13 = vsub.f32 %v1498_v4, %v1504_v11 }
 0x98d   : > { %v2227_v15 = vpop.eup %2226 }
 0x98e   : > { %v1509_v16 = vmul.f32 1.442695, %v1506_v13  ;;  %v1511_v17 = vsel %vm345_vm2, %v2227_v15, 0.0 }
 0x98f   : > { %1512 = vadd.xlane.f32.xlu0 %v1511_v17  ;;  %v1522_v10 = vpop.permute.xlu1 %1521 }
 0x990   : > { %2228 = vpow2.f32 %v1509_v16  ;;  %2080 = vmatpush3.msra.mxu0 %v1522_v10 }
 0x991   : > { %2109 = vmatprep.subr.bf16.mxu0 %v2108_v31 }
 0x993   : > { %v1676_v37 = vpop.permute.xlu1 %1675 }
 0x994   : > { %v1697_v39 = vsel %vm345_vm2, %v2706_v53, %v1676_v37  ;;  %v1944_v53 = vld [vmem:[%s2858_s3] ss:$0 sm:$0xff] }
 0x997   : > { %v1678_v43 = vpop.permute.xlu1 %1677 }
 0x998   : > { %v1698_v45 = vsel %vm345_vm2, %v2708_v55, %v1678_v43 }
 0x99a   : > { %v2229_v19 = vpop.eup %2228 }
 0x99b   : > { %v1514_v20 = vsel %vm345_vm2, %v2229_v19, 0.0  ;;  %v1686_v44 = vpop.permute.xlu1 %1685 }
 0x99c   : > { %1515 = vadd.xlane.f32.xlu0 %v1514_v20  ;;  %v1701_v46 = vsel %vm1699_vm5, %v1698_v45, %v1686_v44 }
 0x9b2   : > { %1597 = vrot.lane.b32.xlu0 %v2643_v9, %s2409_s29  ;;  %v1708_v9 = vld [vmem:[#allocation7 + $0x18] sm:$0xff] }
 0x9b3   : > { %v2112_v32 = vpack.c.bf16 %v1708_v9, %v1707_v30 }
 0x9b6   : > { %1683 = vrot.lane.b32.xlu0 %v1261_v59, %s2411_s9 }
 0xa1c   : > { %v1513_v21 = vpop.xlane.xlu0 %1512 }
 0xa1d   : > { %2230 = vrcp.f32 %v1513_v21 }
 0xa27   : > { %v2231_v22 = vpop.eup %2230 }
 0xa28   : > { %v1518_v23 = vmul.f32 %v2231_v22, %v2227_v15 }
 0xa29   : > { %v1516_v24 = vpop.xlane.xlu0 %1515 }
 0xa2a   : > { %2232 = vrcp.f32 %v1516_v24  ;;  %2082 = vmatmul.mubr.msk.f32.vlgmr.msra.gmra.mrb[12].mxu0 %vm345_vm2, %v1518_v23 }
 0xa2b   : > { %2111 = vmatpush3.bf16.msra.mxu0 %v2108_v31 }
 0xa2c   : > { %2113 = vmatprep.subr.bf16.mxu0 %v2112_v32 }
 0xa2d   : > { %v1598_v25 = vpop.permute.xlu0 %1597 }
 0xa2e   : > { %2085 = vmatpush3.msra.mxu1 %v1598_v25 }
 0xa2f   : > { %2115 = vmatpush3.bf16.msra.mxu0 %v2112_v32 }
 0xa31   : > { %v1684_v38 = vpop.permute.xlu0 %1683 }
 0xa32   : > { %v1700_v40 = vsel %vm1699_vm5, %v1697_v39, %v1684_v38 }
 0xa34   : > { %v2233_v26 = vpop.eup %2232 }
 0xa35   : > { %v1520_v27 = vmul.f32 %v2233_v26, %v2229_v19 }
 0xa37   : > { %2087 = vmatmul.mubr.msk.f32.vlgmr.msra.gmra.mrb[18].mxu1 %vm345_vm2, %v1520_v27 }
 0xafd   : > { %v1593_v33 = vpop.f32.mrb[12].mxu0 }
 0xafe   : > { %1691 = vrot.lane.b32.xlu0 %v1593_v33, %s2412_s24  ;;  %v2083_v34 = vpop.f32.mrb[13].mxu0 }
 0xb0a   : > { %v1669_v35 = vpop.f32.mrb[18].mxu1 }
 0xb0b   : > { %1693 = vrot.lane.b32.xlu1 %v1669_v35, %s2412_s24  ;;  %v2088_v36 = vpop.f32.mrb[19].mxu1 }
 0xb70   : > { %v1692_v41 = vpop.permute.xlu0 %1691 }
 0xb71   : > { %v1703_v42 = vsel %vm1702_vm4, %v1700_v40, %v1692_v41 }
 0xb72   : > { %2097 = vmatprep.mubr.msk.f32.mxu0 %vm253_vm0, %v1703_v42 }
 0xb7d   : > { %v1694_v14 = vpop.permute.xlu1 %1693 }
 0xb7e   : > { %v1704_v47 = vsel %vm1702_vm4, %v1701_v46, %v1694_v14 }
 0xb7f   : > { %2098 = vmatmul.mubr.msk.f32.vlgmr.msra.gmra.mrb[14].mxu0 %vm253_vm0, %v1704_v47 }
 0xc52   : > { %v2099_v48 = vpop.f32.mrb[14].mxu0 }
 0xc53   : > { %v1794_v49 = vadd.f32 %v2099_v48, %v1944_v53  ;;  %v1788_v55 = vpop.f32.mrb[15].mxu0 }
 0xc54   : > { %v1789_v50 = vadd.f32 %v1944_v53, %v1788_v55 }
 0xc55   : > { %1798 = vst.msk [vmem:[%s244_s23 + $0x8] sm:$0xff] %vm253_vm0, %v1794_v49 }
 0xc56   : > { %1797 = vst.msk [vmem:[%s244_s23] sm:$0xff] %vm253_vm0, %v1789_v50 }
 0xc57   : > { %2333 = shalt.err (!%p2330_p1)
}
 0xc58   : > { %s2334_s29 = scalar_lea.hbm %s2808_s7, 256  ;;  %s2338_s25 = scalar_lea.hbm %s2859_s4, 512 }
 0xc59   : > { %p2335_p13 = scmp.ne.s32.totalorder %s2808_s7, %s2334_s29  ;;  %p2339_p4 = scmp.lt.u32.totalorder %s2808_s7, %s2859_s4 }
 0xc5a   : > { %p2340_p5 = scmp.lt.u32.totalorder %s2338_s25, %s2334_s29  ;;  %p2342_p11 = scmp.lt.u32.totalorder %s2334_s29, %s2808_s7 }
 0xc5b   : > { %p2336_p6 = pnand %p2335_p13, %p2875_p0 }
 0xc5c   : > { %p2341_p8 = por %p2340_p5, %p2339_p4 }
 0xc5d   : > { %p2337_p10 = pneg %p2336_p6 }
 0xc5e   : > { %p2343_p2 = por %p2342_p11, %p2341_p8 }
 0xc60   : > { %p2344_p3 = pnand %p2343_p2, %p2337_p10 }
 0xc62   : > { %2347 = shalt.err (!%p2344_p3)
}
 0xc63   : > { %s2414_s12 = smov 128  }
 0xc64   : > { %2126 = dma.vmem_to_hbm [thread:$0]  (%p2875_p0), %s2803_s11, 256, %s2808_s7, %s1800_s10, %s2414_s12, %s2414_s12, %s2410_s5  }
 0xc65 PF: > { %s1828_s30 = sand.u32 1, %s2378_s15   ;;  %p2876_p7 = scmp.ne.s32.totalorder %s2864_s22, 0 }
 0xc66   : > { %p2877_p9 = scmp.ge.s32.totalorder %s2390_s18, 2  ;;  %s1829_s6 = scalar_lea.sflag [#allocation4], %s1828_s30 }
 0xc68   : > { %p2140_p12 = pnand %p2877_p9, %p2876_p7 }
 0xc6a   : > { %2373 = dma.done.wait (!%p2140_p12), %s1829_s6, 256  }
 0xc6b   : > { %2375 = vsyncadd (!%p2140_p12), %s1829_s6, 4294967040  ;;  %p18_p1 = scmp.ge.s32.totalorder %s2556_s26, 4   ;;  %s2878_s15 = smov %s2382_s16 }
 0xc6c   : > { %s2879_s16 = smov %s2386_s17  ;;  %s2880_s17 = smov %s2572_s14 }
 0xc6d   : > { %s2881_s18 = smov %s2556_s26  ;;  %20 = sbr.rel (!%p18_p1) target bundleno = 6 (0x6), region = 89 }
 0xc74   :  { %1834 = vsyncpa [#allocation3], 1 }
 0xc75   :  { %1836 = vsyncpa [#allocation3 + $0x1], 1 }
 0xc76   :  { %1837 = vsyncpa [#allocation6], 1 }
 0xc77   :  { %1838 = vsyncpa [#allocation4], 1 }
 0xc78   :  { %1840 = vsyncpa [#allocation4 + $0x1], 1 }

</bundles_post_ra>
